<compile_context>
chip_gen: v5e
topology: v5e:2x2
jax: 0.10.0
libtpu: 0.0.40
codegen_flags: <defaults>
</compile_context>

<pallas_src>
import math

import jax
import jax.numpy as jnp
from jax.experimental import pallas as pl
from jax.experimental.pallas import tpu as pltpu

_LANE = 512               # preferred lane-dense last dim (multiple of 128)
_MIN_TILE_ROWS = 32       # sublane-tile multiple that is also int8-friendly


def _round_up(x: int, m: int) -> int:
    return ((x + m - 1) // m) * m


_budget_cache = None


def _budget():
    """(max_block_bytes, vmem_limit_bytes), selected per TPU generation."""
    global _budget_cache
    if _budget_cache is not None:
        return _budget_cache
    vmem = None
    try:
        vmem = int(pltpu.get_tpu_info().vmem_capacity_bytes)
    except Exception:
        vmem = None
    if vmem is not None and vmem < 48 * 1024 * 1024:
        # Small-VMEM part: stay well inside the physical budget.
        _budget_cache = (1 * 1024 * 1024, 16 * 1024 * 1024)
    elif vmem is not None and vmem <= 80 * 1024 * 1024:
        # v7x-class: 64 MiB VMEM but ~3.2 TB/s HBM -> larger blocks to amortize
        # the ~0.35us per-step cost. Worst-case footprint: 4 f32 streams x
        # 2 buffers x 4 MiB = 32 MiB, under the 40 MiB scoped request.
        _budget_cache = (4 * 1024 * 1024, 40 * 1024 * 1024)
    else:
        # v5e/v6e (128 MiB VMEM) or unknown: 2 MiB blocks already sit at ~85%
        # of the HBM roofline; 16 MiB double-buffered footprint, 32 MiB limit.
        _budget_cache = (2 * 1024 * 1024, 32 * 1024 * 1024)
    return _budget_cache


def _fold(x: jax.Array, total: int):
    """Reshape (pad only if ragged) a tensor into a lane-dense (rows, L) slab."""
    flat = x.reshape(-1)
    for lane in (_LANE, 256, 128):
        if total % lane == 0:            # aligned case: pure layout, no pad
            return flat.reshape(total // lane, lane), False
    rows = pl.cdiv(total, _LANE)
    flat = jnp.pad(flat, (0, rows * _LANE - total))   # < _LANE pad elements
    return flat.reshape(rows, _LANE), True


def _unfold(slab: jax.Array, total: int, shape, padded: bool) -> jax.Array:
    if padded:
        return slab.reshape(-1)[:total].reshape(shape)
    return slab.reshape(shape)


def _plan(rows: int, max_tile_rows: int):
    """Pick (tile_rows, grid) for a (rows, lane) slab.

    Prefers an even grid of >=2 steps (double-buffer overlap, v7x megacore
    balance) with tile_rows a multiple of 32; trailing partial blocks are
    clipped by Pallas, so rows are never padded up to a tile multiple.
    """
    if rows <= 2 * _MIN_TILE_ROWS:
        return rows, 1                       # tiny: one full-extent block
    for g in (8, 6, 4, 2):                   # even step counts, largest first
        tile = _round_up(pl.cdiv(rows, g), _MIN_TILE_ROWS)
        if tile <= max_tile_rows and pl.cdiv(rows, tile) == g:
            return tile, g
    tile = min(max_tile_rows, _round_up(pl.cdiv(rows, 8), _MIN_TILE_ROWS))
    return tile, pl.cdiv(rows, tile)


def _sigmoid_cast_kernel(preds_ref, targs_ref, preds_out_ref, targs_out_ref):
    # lax.logistic keeps the transcendental on the (otherwise idle) EUP; bf16
    # inputs stay bf16 on v6e/v7x (no f32 up-cast).
    preds_out_ref[...] = jax.nn.sigmoid(preds_ref[...]).astype(preds_out_ref.dtype)
    targs_out_ref[...] = targs_ref[...].astype(targs_out_ref.dtype)


def _sigmoid_kernel(preds_ref, preds_out_ref):
    preds_out_ref[...] = jax.nn.sigmoid(preds_ref[...]).astype(preds_out_ref.dtype)


class BaseLossPallas:
    """JAX/Pallas equivalent of the PyTorch BaseLoss preprocessing path."""

    def __init__(self, normalize: bool = True):
        self.normalize = normalize

    def __call__(self, preds: jax.Array, targs: jax.Array):
        assert len(preds.shape) > 2, preds.shape
        assert preds.shape == targs.shape, (
            f"preds: {preds.shape}, targs: {targs.shape}")

        shape = preds.shape
        out_dtype = preds.dtype

        if not self.normalize:
            # preds untouched; a bare dtype convert is already HBM-roofline in
            # XLA, so no Pallas kernel (and no slab round-trip) here.
            if targs.dtype != out_dtype:
                targs = targs.astype(out_dtype)
            return preds, targs

        total = math.prod(shape)
        preds_slab, padded = _fold(preds, total)
        rows, lane = preds_slab.shape

        max_block_bytes, vmem_limit = _budget()
        row_bytes = lane * jnp.dtype(out_dtype).itemsize       # widest stream
        max_tile_rows = max(
            _MIN_TILE_ROWS,
            (max_block_bytes // row_bytes) // _MIN_TILE_ROWS * _MIN_TILE_ROWS)
        tile, grid = _plan(rows, max_tile_rows)

        spec = pl.BlockSpec((tile, lane), lambda i: (i, 0))
        cparams = pltpu.CompilerParams(
            dimension_semantics=("parallel",),
            vmem_limit_bytes=vmem_limit)

        if targs.dtype == out_dtype:
            # targs cast is a no-op -> only stream preds through the kernel.
            preds_n = pl.pallas_call(
                _sigmoid_kernel,
                out_shape=jax.ShapeDtypeStruct((rows, lane), out_dtype),
                grid_spec=pltpu.PrefetchScalarGridSpec(
                    num_scalar_prefetch=0, grid=(grid,),
                    in_specs=[spec], out_specs=spec),
                compiler_params=cparams,
            )(preds_slab)
            return _unfold(preds_n, total, shape, padded), targs

        targs_slab, _ = _fold(targs, total)
        preds_n, targs_c = pl.pallas_call(
            _sigmoid_cast_kernel,
            out_shape=(jax.ShapeDtypeStruct((rows, lane), out_dtype),
                       jax.ShapeDtypeStruct((rows, lane), out_dtype)),
            grid_spec=pltpu.PrefetchScalarGridSpec(
                num_scalar_prefetch=0, grid=(grid,),
                in_specs=[spec, spec],
                out_specs=[spec, spec]),
            compiler_params=cparams,
        )(preds_slab, targs_slab)
        # TODO(synk): forward() is @abstractmethod upstream; concrete subclasses should fuse their loss reduction into this kernel (per-block partial sums on an "arbitrary" axis) so the preprocessed arrays never round-trip HBM.
        return (_unfold(preds_n, total, shape, padded),
                _unfold(targs_c, total, shape, padded))


if __name__ == "__main__":
    key = jax.random.PRNGKey(0)
    k1, k2, k3, k4, k5, k6, k7 = jax.random.split(key, 7)

    # Case 1: normalize=True, lane-aligned NCHW shape, int8 binary mask targs.
    B, C, H, W = 2, 4, 16, 16
    preds = jax.random.normal(k1, (B, C, H, W), dtype=jnp.float32)
    targs = (jax.random.uniform(k2, (B, C, H, W)) > 0.5).astype(jnp.int8)
    pn, tc = BaseLossPallas(normalize=True)(preds, targs)
    jax.block_until_ready((pn, tc))
    assert pn.dtype == preds.dtype and tc.dtype == preds.dtype
    assert pn.shape == preds.shape and tc.shape == targs.shape
    assert jnp.allclose(pn, jax.nn.sigmoid(preds), atol=1e-6), "preds mismatch"
    assert jnp.allclose(tc, targs.astype(preds.dtype)), "targs mismatch"

    # Case 2: ragged shape (total not a multiple of 128) -> exercises pad path.
    shape2 = (2, 3, 7, 5)
    p2 = jax.random.normal(k3, shape2, dtype=jnp.float32)
    t2 = (jax.random.uniform(k4, shape2) > 0.5).astype(jnp.int8)
    pn2, tc2 = BaseLossPallas(normalize=True)(p2, t2)
    jax.block_until_ready((pn2, tc2))
    assert jnp.allclose(pn2, jax.nn.sigmoid(p2), atol=1e-6), "preds mismatch (ragged)"
    assert jnp.allclose(tc2, t2.astype(p2.dtype)), "targs mismatch (ragged)"

    # Case 3: multi-block grid with a clipped trailing partial block
    #         (168 rows -> tile=32, grid=6, trailing block of 8 rows).
    shape3 = (2, 4, 84, 128)
    p3 = jax.random.normal(k5, shape3, dtype=jnp.float32)
    t3 = (jax.random.uniform(k6, shape3) > 0.5).astype(jnp.int8)
    pn3, tc3 = BaseLossPallas(normalize=True)(p3, t3)
    jax.block_until_ready((pn3, tc3))
    assert jnp.allclose(pn3, jax.nn.sigmoid(p3), atol=1e-6), "preds mismatch (multi-block)"
    assert jnp.allclose(tc3, t3.astype(p3.dtype)), "targs mismatch (multi-block)"

    # Case 4: targs already in preds' dtype -> single-stream sigmoid kernel.
    t4 = (jax.random.uniform(k7, (B, C, H, W)) > 0.5).astype(jnp.float32)
    pn4, tc4 = BaseLossPallas(normalize=True)(preds, t4)
    jax.block_until_ready((pn4, tc4))
    assert jnp.allclose(pn4, jax.nn.sigmoid(preds), atol=1e-6), "preds mismatch (same-dtype)"
    assert jnp.allclose(tc4, t4), "targs mismatch (same-dtype)"

    # Case 5: normalize=False -> preds pass-through, targs cast by XLA only.
    pn5, tc5 = BaseLossPallas(normalize=False)(preds, targs)
    jax.block_until_ready((pn5, tc5))
    assert jnp.allclose(pn5, preds), "preds must be untouched when normalize=False"
    assert tc5.dtype == preds.dtype
    assert jnp.allclose(tc5, targs.astype(preds.dtype)), "targs mismatch (no-norm)"

    print("KERNEL_OK")
</pallas_src>

<mosaic_0001>
module attributes {stable_mosaic.version = 11 : i64} {
  func.func @_sigmoid_cast_kernel(%arg0: i32, %arg1: memref<4x512xf32, #tpu.memory_space<vmem>>, %arg2: memref<4x512xi8, #tpu.memory_space<vmem>>, %arg3: memref<4x512xf32, #tpu.memory_space<vmem>>, %arg4: memref<4x512xf32, #tpu.memory_space<vmem>>) attributes {dimension_semantics = [#tpu.dimension_semantics<parallel>], iteration_bounds = array<i64: 1>, scalar_prefetch = 0 : i64, scratch_operands = 0 : i64, tpu.core_type = #tpu.core_type<tc>, window_params = [{transform_indices = @transform_0, window_bounds = array<i64: 4, 512>}, {transform_indices = @transform_1, window_bounds = array<i64: 4, 512>}, {transform_indices = @transform_2, window_bounds = array<i64: 4, 512>}, {transform_indices = @transform_3, window_bounds = array<i64: 4, 512>}]} {
    %c0 = arith.constant 0 : index
    %c0_0 = arith.constant 0 : index
    %0 = vector.load %arg1[%c0, %c0_0] : memref<4x512xf32, #tpu.memory_space<vmem>>, vector<4x512xf32>
    %1 = arith.negf %0 : vector<4x512xf32>
    %2 = math.exp %1 : vector<4x512xf32>
    %cst = arith.constant 1.000000e+00 : f32
    %3 = vector.broadcast %cst : f32 to vector<4x512xf32>
    %4 = arith.addf %3, %2 : vector<4x512xf32>
    %5 = arith.divf %3, %4 : vector<4x512xf32>
    %c0_1 = arith.constant 0 : index
    %c0_2 = arith.constant 0 : index
    %6 = vector.load %arg3[%c0_1, %c0_2] : memref<4x512xf32, #tpu.memory_space<vmem>>, vector<4x512xf32>
    tpu.vector_store %arg3[%c0_1, %c0_2], %5 {strides = array<i32>} : memref<4x512xf32, #tpu.memory_space<vmem>>, vector<4x512xf32>,
    %c0_3 = arith.constant 0 : index
    %c0_4 = arith.constant 0 : index
    %7 = vector.load %arg2[%c0_3, %c0_4] : memref<4x512xi8, #tpu.memory_space<vmem>>, vector<4x512xi8>
    %8 = arith.sitofp %7 : vector<4x512xi8> to vector<4x512xf32>
    %c0_5 = arith.constant 0 : index
    %c0_6 = arith.constant 0 : index
    %9 = vector.load %arg4[%c0_5, %c0_6] : memref<4x512xf32, #tpu.memory_space<vmem>>, vector<4x512xf32>
    tpu.vector_store %arg4[%c0_5, %c0_6], %8 {strides = array<i32>} : memref<4x512xf32, #tpu.memory_space<vmem>>, vector<4x512xf32>,
    return
  }
  func.func @transform_0(%arg0: i32) -> (i32, i32) {
    %c0_i32 = arith.constant 0 : i32
    %c0_i32_0 = arith.constant 0 : i32
    return %arg0, %c0_i32 : i32, i32
  }
  func.func @transform_1(%arg0: i32) -> (i32, i32) {
    %c0_i32 = arith.constant 0 : i32
    %c0_i32_0 = arith.constant 0 : i32
    return %arg0, %c0_i32 : i32, i32
  }
  func.func @transform_2(%arg0: i32) -> (i32, i32) {
    %c0_i32 = arith.constant 0 : i32
    %c0_i32_0 = arith.constant 0 : i32
    return %arg0, %c0_i32 : i32, i32
  }
  func.func @transform_3(%arg0: i32) -> (i32, i32) {
    %c0_i32 = arith.constant 0 : i32
    %c0_i32_0 = arith.constant 0 : i32
    return %arg0, %c0_i32 : i32, i32
  }
}

</mosaic_0001>

<bundles_post_ra>
// kernel: tpu_custom_call.1
= control target key start
LH: loop header
LB: loop body
LE: loop exit
PB: predicated region body
PF: predicated region fallthrough
CT: control target
= control target key end

     0   :  { %9 = vsyncpa [#allocation3], 0  ;;  %s280_s0 = inlined_call_operand.hbm [shape: f32[4,512], index: 0, kind: input, shape index: {}]   ;;  %s281_s1 = inlined_call_operand.hbm [shape: s8[4,512], index: 1, kind: input, shape index: {}]   ;;  %s282_s2 = inlined_call_operand.hbm [shape: f32[4,512], index: 2, kind: output, shape index: {0}]   ;;  %s283_s3 = inlined_call_operand.hbm [shape: f32[4,512], index: 3, kind: output, shape index: {1}]  }
   0x1   :  { %10 = vsyncpa [#allocation6], 0 }
   0x2   :  { %11 = vsyncpa [#allocation4], 0 }
   0x3   :  { %12 = vsyncpa [#allocation9], 0  ;;  %s18_s14 = sshll.u32 %s280_s0, 4  ;;  %s244_s15 = smov [#allocation2]   ;;  %s19_s14 = int_to_ptr.hbm [resolvable:$true] %s18_s14 }
   0x4   :  { %s20_s16 = sshll.u32 %s244_s15, 4  ;;  %s29_s19 = sshll.u32 %s281_s1, 4  ;;  %s21_s16 = int_to_ptr.vmem [resolvable:$true] %s20_s16  ;;  %s30_s19 = int_to_ptr.hbm [resolvable:$true] %s29_s19 }
   0x5   :  { %23 = dma.hbm_to_vmem [thread:$0]  %s19_s14, 256, %s21_s16, [#allocation3]  }
   0x6   :  { %s245_s20 = smov [#allocation5]  }
   0x7   :  { %s31_s21 = sshll.u32 %s245_s20, 4  ;;  %s32_s21 = int_to_ptr.vmem [resolvable:$true] %s31_s21 }
   0x8   :  { %34 = dma.hbm_to_vmem [thread:$0]  %s30_s19, 64, %s32_s21, [#allocation6]  }
   0x9   :  { %236 = dma.done.wait [#allocation3], 256  }
   0xa   :  { %237 = vsyncadd [#allocation3], 4294967040 }
   0xb   :  { %238 = dma.done.wait [#allocation6], 64  }
   0xc   :  { %239 = vsyncadd [#allocation6], 4294967232  ;;  %v43_v0 = vld [vmem:[#allocation2] sm:$0xff]  ;;  %v44_v1 = vld [vmem:[#allocation2 + $0x8] sm:$0xff]  ;;  %s246_s0 = smov [#allocation8]   ;;  %s110_s24 = sshll.u32 %s283_s3, 4  ;;  %s111_s24 = int_to_ptr.hbm [resolvable:$true] %s110_s24 }
   0xd   :  { %v85_v2 = vld [vmem:[#allocation5] sm:$0xf]  ;;  %v126_v3 = vmul.f32 -1.442695, %v43_v0  ;;  %v127_v4 = vmul.f32 -1.442695, %v44_v1 }
   0xe   :  { %v86_v5 = vunpack.c.0.s8 %v85_v2  ;;  %v87_v6 = vunpack.c.1.s8 %v85_v2  ;;  %s108_s22 = sshll.u32 %s246_s0, 4  ;;  %s247_s3 = smov [#allocation7]   ;;  %s109_s22 = int_to_ptr.vmem [resolvable:$true] %s108_s22 }
   0xf   :  { %132 = vpow2.f32 %v126_v3  ;;  %s97_s25 = sshll.u32 %s247_s3, 4  ;;  %s99_s28 = sshll.u32 %s282_s2, 4  ;;  %s98_s25 = int_to_ptr.vmem [resolvable:$true] %s97_s25  ;;  %s100_s28 = int_to_ptr.hbm [resolvable:$true] %s99_s28 }
  0x10   :  { %v88_v7 = vcvt.s32.f32 %v86_v5  ;;  %v89_v8 = vcvt.s32.f32 %v87_v6  ;;  %134 = vpow2.f32 %v127_v4 }
  0x12   :  { %90 = vst [vmem:[#allocation8] sm:$0xff] %v88_v7 }
  0x13   :  { %91 = vst [vmem:[#allocation8 + $0x8] sm:$0xff] %v89_v8 }
  0x14   :  { %113 = dma.vmem_to_hbm [thread:$0]  %s109_s22, 256, %s111_s24, [#allocation9]  }
  0x15   :  { %v133_v9 = vpop.eup %132 }
  0x16   :  { %v135_v10 = vpop.eup %134  ;;  %v51_v11 = vadd.f32 1.0, %v133_v9 }
  0x17   :  { %v52_v12 = vadd.f32 1.0, %v135_v10 }
  0x18   :  { %136 = vrcp.f32 %v51_v11  ;;  %vm58_vm0 = vweird.f32 %v51_v11  ;;  %v64_v16 = vand.u32 2147483648, %v51_v11  ;;  %v62_v19 = vand.u32 2147483647, %v51_v11 }
  0x19   :  { %138 = vrcp.f32 %v52_v12  ;;  %v79_v20 = vand.u32 2147483648, %v52_v12  ;;  %vm73_vm2 = vweird.f32 %v52_v12  ;;  %v77_v22 = vand.u32 2147483647, %v52_v12 }
  0x1a   :  { %v65_v24 = vor.u32 1.1754944e-38, %v64_v16  ;;  %vm63_vm5 = vcmp.eq.f32.partialorder %v62_v19, 8.507059e+37 }
  0x1b   :  { %v80_v27 = vor.u32 1.1754944e-38, %v79_v20  ;;  %vm78_vm7 = vcmp.eq.f32.partialorder %v77_v22, 8.507059e+37 }
  0x1e   :  { %v137_v13 = vpop.eup %136 }
  0x1f   :  { %v139_v14 = vpop.eup %138  ;;  %v54_v15 = vmul.f32 %v137_v13, %v51_v11  ;;  %vm59_vm1 = vweird.f32 %v137_v13 }
  0x20   :  { %v69_v17 = vmul.f32 %v139_v14, %v52_v12  ;;  %vm74_vm3 = vweird.f32 %v139_v14  ;;  %vm60_vm4 = vmor %vm58_vm0, %vm59_vm1 }
  0x21   :  { %v55_v18 = vsub.f32 1.0, %v54_v15  ;;  %vm75_vm6 = vmor %vm73_vm2, %vm74_vm3 }
  0x22   :  { %v70_v21 = vsub.f32 1.0, %v69_v17 }
  0x23   :  { %v56_v23 = vmul.f32 %v137_v13, %v55_v18 }
  0x24   :  { %v71_v25 = vmul.f32 %v139_v14, %v70_v21 }
  0x25   :  { %v57_v26 = vadd.f32 %v137_v13, %v56_v23 }
  0x26   :  { %v72_v28 = vadd.f32 %v139_v14, %v71_v25 }
  0x27   :  { %v61_v29 = vsel %vm60_vm4, %v137_v13, %v57_v26 }
  0x28   :  { %v66_v30 = vsel %vm63_vm5, %v65_v24, %v61_v29  ;;  %v76_v31 = vsel %vm75_vm6, %v139_v14, %v72_v28 }
  0x29   :  { %83 = vst [vmem:[#allocation7] sm:$0xff] %v66_v30  ;;  %v81_v32 = vsel %vm78_vm7, %v80_v27, %v76_v31 }
  0x2a   :  { %84 = vst [vmem:[#allocation7 + $0x8] sm:$0xff] %v81_v32 }
  0x2b   :  { %102 = dma.vmem_to_hbm [thread:$0]  %s98_s25, 256, %s100_s28, [#allocation4]  }
  0x2c   :  { %240 = dma.done.wait [#allocation4], 256  }
  0x2d   :  { %241 = vsyncadd [#allocation4], 4294967040 }
  0x2e   :  { %242 = dma.done.wait [#allocation9], 256  }
  0x2f   :  { %243 = vsyncadd [#allocation9], 4294967040 }
  0x30   :  { %122 = vsyncpa [#allocation3], 1 }
  0x31   :  { %123 = vsyncpa [#allocation6], 1 }
  0x32   :  { %124 = vsyncpa [#allocation4], 1 }
  0x33   :  { %125 = vsyncpa [#allocation9], 1 }

</bundles_post_ra>
